<compile_context>
chip_gen: v5e
topology: v5e:2x2
jax: 0.10.0
libtpu: 0.0.40
codegen_flags: <defaults>
</compile_context>

<pallas_src>
import functools

import jax
import jax.numpy as jnp
from jax import lax
from jax.experimental import pallas as pl
from jax.experimental.pallas import tpu as pltpu


def _round_up(x, m):
    return ((x + m - 1) // m) * m


# ---------------------------------------------------------------------------
# Phase 1: accumulate v = B @ x_reduced over HW tiles, then run the GCN.
# ---------------------------------------------------------------------------
def _glore_reduce_kernel(x_ref,        # (1, T, C_pad)   bf16
                         wf_ref,       # (C_pad, N+M)    bf16  (theta | phi, fused)
                         bias_ref,     # (1, N+M)        f32   (bt | bp)
                         w1_ref,       # (N_pad, N_pad)  f32
                         w2t_ref,      # (M_pad, M_pad)  f32   (= w2.T)
                         zbias_ref,    # (N_pad, M_pad)  f32   (b1 ⊗ rowsum(w2) + b2)
                         z_ref,        # (1, N_pad, M_pad) f32 output
                         v_acc,        # (N_pad, M_pad)  f32 scratch accumulator
                         *, tile_rows, hw, n_pad, need_row_mask):
    t = pl.program_id(1)

    @pl.when(t == 0)
    def _():
        v_acc[...] = jnp.zeros_like(v_acc)

    xt = x_ref[0]                                                   # (T, C_pad) bf16
    # Fused theta+phi projection: one lane-dense MXU pass over x.
    proj = jnp.dot(xt, wf_ref[...], preferred_element_type=jnp.float32)  # (T, N+M)
    bias = bias_ref[...]
    if need_row_mask:
        # Zero-padded HW rows produce proj == 0; only keep the bias out of them
        # so they contribute nothing to v.
        rows = t * tile_rows + lax.broadcasted_iota(jnp.int32, (tile_rows, 1), 0)
        bias = bias * (rows < hw).astype(jnp.float32)
    proj = proj + bias

    bt = proj[:, :n_pad].astype(jnp.bfloat16)                       # (T, N_pad)
    xr = proj[:, n_pad:].astype(jnp.bfloat16)                       # (T, M_pad)
    # v += B^T @ x_reduced -- MXU consumes the transposed LHS directly,
    # no (N, HW) materialization and no XLU transpose pass.
    v_acc[...] += lax.dot_general(
        bt, xr, dimension_numbers=(((0,), (0,)), ((), ())),
        preferred_element_type=jnp.float32)

    @pl.when(t == pl.num_programs(1) - 1)
    def _():
        v = v_acc[...]
        # GCN: z = w1 @ v @ w2^T + (b1 ⊗ rowsum(w2) + b2)   (biases pre-folded)
        h = jnp.dot(w1_ref[...], v, preferred_element_type=jnp.float32)
        z = jnp.dot(h, w2t_ref[...], preferred_element_type=jnp.float32) + zbias_ref[...]
        z_ref[0] = z


# ---------------------------------------------------------------------------
# Phase 2: per HW tile, y = B_tile @ z, x_res = y @ Wphi_inv, out = x + x_res.
# ---------------------------------------------------------------------------
def _glore_produce_kernel(x_ref,       # (1, T, C_pad)     bf16
                          wt_ref,      # (C_pad, N_pad)    bf16
                          bt_ref,      # (1, N_pad)        f32
                          z_ref,       # (1, N_pad, M_pad) f32
                          wpi_ref,     # (M_pad, C_pad)    bf16
                          bpi_ref,     # (1, C_pad)        f32
                          out_ref):    # (1, T, C_pad)     f32
    xt = x_ref[0]                                                   # (T, C_pad) bf16
    b_t = jnp.dot(xt, wt_ref[...], preferred_element_type=jnp.float32) + bt_ref[...]
    y = jnp.dot(b_t.astype(jnp.bfloat16), z_ref[0].astype(jnp.bfloat16),
                preferred_element_type=jnp.float32)                 # (T, M_pad)
    x_res = jnp.dot(y.astype(jnp.bfloat16), wpi_ref[...],
                    preferred_element_type=jnp.float32) + bpi_ref[...]
    # Re-read x from VMEM for the residual (keeps vreg pressure low).
    out_ref[0] = x_ref[0].astype(jnp.float32) + x_res


def glore_forward(x_nchw, params, *, N, mid_channels, tile_rows=512):
    """x_nchw: (batch, C, H, W) float32. Returns (batch, C, H, W) float32."""
    batch, C, H, W = x_nchw.shape
    M = mid_channels
    HW = H * W
    (wt, bt, wp, bp, w1, b1, w2, b2, wpi, bpi) = params

    f32, bf16 = jnp.float32, jnp.bfloat16

    # ---- padded sizes: lanes multiples of 128, row tiles multiples of 64 ----
    C_pad = _round_up(C, 128)
    N_pad = _round_up(N, 128)
    M_pad = _round_up(M, 128)
    NM_pad = N_pad + M_pad
    T = _round_up(min(tile_rows, HW), 64)
    HW_pad = _round_up(HW, T)
    n_tiles = HW_pad // T

    def pad2(a, r, c):
        return jnp.pad(a, ((0, r - a.shape[0]), (0, c - a.shape[1])))

    # NCHW -> (batch, HW_pad, C_pad), bf16 (halves HBM traffic / VMEM tiles).
    x_flat = jnp.transpose(x_nchw.reshape(batch, C, HW), (0, 2, 1)).astype(f32)
    x_pad = jnp.pad(x_flat, ((0, 0), (0, HW_pad - HW), (0, C_pad - C))).astype(bf16)

    # Fused theta|phi projection weights + biases (phase 1).
    w_fused = jnp.concatenate(
        [pad2(wt.T, C_pad, N_pad), pad2(wp.T, C_pad, M_pad)], axis=1).astype(bf16)
    bias_fused = jnp.concatenate(
        [jnp.pad(bt, (0, N_pad - N)), jnp.pad(bp, (0, M_pad - M))]
    ).reshape(1, NM_pad).astype(f32)

    # GCN (tiny): keep f32; fold both conv1d biases into one (N, M) term:
    #   z = w1 @ v @ w2^T + (b1[:,None] * rowsum(w2)[None,:] + b2[None,:])
    w1_pad = pad2(w1, N_pad, N_pad).astype(f32)
    w2t_pad = pad2(w2.T, M_pad, M_pad).astype(f32)
    zbias = b1[:, None] * jnp.sum(w2, axis=1)[None, :] + b2[None, :]
    zbias_pad = pad2(zbias, N_pad, M_pad).astype(f32)

    # Phase-2 weights.
    wt_pad = pad2(wt.T, C_pad, N_pad).astype(bf16)
    bt_row = jnp.pad(bt, (0, N_pad - N)).reshape(1, N_pad).astype(f32)
    wpi_pad = pad2(wpi.T, M_pad, C_pad).astype(bf16)
    bpi_row = jnp.pad(bpi, (0, C_pad - C)).reshape(1, C_pad).astype(f32)

    full = lambda shape: pl.BlockSpec(shape, lambda b, t: (0,) * len(shape))

    # Tile-sized VMEM; 48 MiB fits every generation (v7x physical = 64 MiB).
    vmem_limit = 48 * 1024 * 1024

    # ------------------------- phase 1: reduce to z -------------------------
    reduce_kernel = functools.partial(
        _glore_reduce_kernel, tile_rows=T, hw=HW, n_pad=N_pad,
        need_row_mask=(HW_pad != HW))

    z = pl.pallas_call(
        reduce_kernel,
        out_shape=jax.ShapeDtypeStruct((batch, N_pad, M_pad), f32),
        grid_spec=pltpu.PrefetchScalarGridSpec(
            num_scalar_prefetch=0,
            grid=(batch, n_tiles),
            in_specs=[
                pl.BlockSpec((1, T, C_pad), lambda b, t: (b, t, 0)),
                full((C_pad, NM_pad)),
                full((1, NM_pad)),
                full((N_pad, N_pad)),
                full((M_pad, M_pad)),
                full((N_pad, M_pad)),
            ],
            out_specs=pl.BlockSpec((1, N_pad, M_pad), lambda b, t: (b, 0, 0)),
            scratch_shapes=[pltpu.VMEM((N_pad, M_pad), f32)],
        ),
        compiler_params=pltpu.CompilerParams(
            dimension_semantics=("parallel", "arbitrary"),
            vmem_limit_bytes=vmem_limit),
    )(x_pad, w_fused, bias_fused, w1_pad, w2t_pad, zbias_pad)

    # ---------------------- phase 2: stream output tiles --------------------
    out_pad = pl.pallas_call(
        _glore_produce_kernel,
        out_shape=jax.ShapeDtypeStruct((batch, HW_pad, C_pad), f32),
        grid_spec=pltpu.PrefetchScalarGridSpec(
            num_scalar_prefetch=0,
            grid=(batch, n_tiles),
            in_specs=[
                pl.BlockSpec((1, T, C_pad), lambda b, t: (b, t, 0)),
                full((C_pad, N_pad)),
                full((1, N_pad)),
                pl.BlockSpec((1, N_pad, M_pad), lambda b, t: (b, 0, 0)),
                full((M_pad, C_pad)),
                full((1, C_pad)),
            ],
            out_specs=pl.BlockSpec((1, T, C_pad), lambda b, t: (b, t, 0)),
        ),
        compiler_params=pltpu.CompilerParams(
            dimension_semantics=("parallel", "parallel"),
            vmem_limit_bytes=vmem_limit),
    )(x_pad, wt_pad, bt_row, z, wpi_pad, bpi_row)

    out = out_pad[:, :HW, :C]
    return jnp.transpose(out, (0, 2, 1)).reshape(batch, C, H, W)


def glore_reference(x_nchw, params, *, N, mid_channels):
    """Pure-JAX f32 reference mirroring the PyTorch forward (NCHW)."""
    batch, C, H, W = x_nchw.shape
    HW = H * W
    (wt, bt, wp, bp, w1, b1, w2, b2, wpi, bpi) = params

    xf = x_nchw.reshape(batch, C, HW)                                   # (B, C, HW)
    B_mat = jnp.einsum('nc,bcl->bnl', wt, xf) + bt[None, :, None]       # (B, N, HW)
    x_red = jnp.einsum('mc,bcl->bml', wp, xf) + bp[None, :, None]       # (B, M, HW)
    x_red = jnp.transpose(x_red, (0, 2, 1))                             # (B, HW, M)
    v = jnp.einsum('bnl,blm->bnm', B_mat, x_red)                        # (B, N, M)
    h = jnp.einsum('on,bnm->bom', w1, v) + b1[None, :, None]            # (B, N, M)
    z = jnp.einsum('om,bnm->bno', w2, h) + b2[None, None, :]            # (B, N, M)
    y = jnp.einsum('bnl,bnm->blm', B_mat, z)                            # (B, HW, M)
    x_res = jnp.einsum('cm,blm->bcl', wpi, y) + bpi[None, :, None]      # (B, C, HW)
    return x_nchw + x_res.reshape(batch, C, H, W)


def make_params(key, in_channels, mid_channels, N):
    C, M = in_channels, mid_channels
    ks = jax.random.split(key, 10)
    s = 0.1
    wt = s * jax.random.normal(ks[0], (N, C), jnp.float32)     # theta.weight (1x1)
    bt = s * jax.random.normal(ks[1], (N,), jnp.float32)
    wp = s * jax.random.normal(ks[2], (M, C), jnp.float32)     # phi.weight
    bp = s * jax.random.normal(ks[3], (M,), jnp.float32)
    w1 = s * jax.random.normal(ks[4], (N, N), jnp.float32)     # gcn.conv1d_1.weight
    b1 = s * jax.random.normal(ks[5], (N,), jnp.float32)
    w2 = s * jax.random.normal(ks[6], (M, M), jnp.float32)     # gcn.conv1d_2.weight
    b2 = s * jax.random.normal(ks[7], (M,), jnp.float32)
    wpi = s * jax.random.normal(ks[8], (C, M), jnp.float32)    # phi_inv.weight
    bpi = s * jax.random.normal(ks[9], (C,), jnp.float32)
    return (wt, bt, wp, bp, w1, b1, w2, b2, wpi, bpi)


if __name__ == "__main__":
    batch, in_channels, H, W = 2, 4, 16, 16
    mid_channels, N = 8, 8

    key = jax.random.PRNGKey(0)
    kx, kp = jax.random.split(key)
    x = jax.random.normal(kx, (batch, in_channels, H, W), jnp.float32)
    params = make_params(kp, in_channels, mid_channels, N)

    # tile_rows=128 -> 2 HW tiles at this toy size, exercising the
    # accumulate / finalize pipeline path.
    out = glore_forward(x, params, N=N, mid_channels=mid_channels, tile_rows=128)
    out = jax.block_until_ready(out)

    ref = glore_reference(x, params, N=N, mid_channels=mid_channels)
    assert out.shape == (batch, in_channels, H, W)
    # bf16 MXU inputs with f32 accumulation -> loosened tolerance vs f32 reference.
    assert jnp.allclose(out, ref, atol=5e-2, rtol=5e-2), "mismatch vs reference"

    print("KERNEL_OK")
</pallas_src>

<mosaic_0001>
module attributes {stable_mosaic.version = 11 : i64} {
  func.func @_glore_reduce_kernel(%arg0: i32, %arg1: i32, %arg2: memref<1x128x128xbf16, #tpu.memory_space<vmem>>, %arg3: memref<128x256xbf16, #tpu.memory_space<vmem>>, %arg4: memref<1x256xf32, #tpu.memory_space<vmem>>, %arg5: memref<128x128xf32, #tpu.memory_space<vmem>>, %arg6: memref<128x128xf32, #tpu.memory_space<vmem>>, %arg7: memref<128x128xf32, #tpu.memory_space<vmem>>, %arg8: memref<1x128x128xf32, #tpu.memory_space<vmem>>, %arg9: memref<128x128xf32, #tpu.memory_space<vmem>>) attributes {dimension_semantics = [#tpu.dimension_semantics<parallel>, #tpu.dimension_semantics<arbitrary>], iteration_bounds = array<i64: 2, 2>, scalar_prefetch = 0 : i64, scratch_operands = 1 : i64, tpu.core_type = #tpu.core_type<tc>, window_params = [{transform_indices = @transform_0, window_bounds = array<i64: 1, 128, 128>}, {pipeline_mode = #tpu.pipeline_mode<synchronous>, transform_indices = @transform_1, window_bounds = array<i64: 128, 256>}, {pipeline_mode = #tpu.pipeline_mode<synchronous>, transform_indices = @transform_2, window_bounds = array<i64: 1, 256>}, {pipeline_mode = #tpu.pipeline_mode<synchronous>, transform_indices = @transform_3, window_bounds = array<i64: 128, 128>}, {pipeline_mode = #tpu.pipeline_mode<synchronous>, transform_indices = @transform_4, window_bounds = array<i64: 128, 128>}, {pipeline_mode = #tpu.pipeline_mode<synchronous>, transform_indices = @transform_5, window_bounds = array<i64: 128, 128>}, {transform_indices = @transform_6, window_bounds = array<i64: 1, 128, 128>}]} {
    %c0_i32 = arith.constant 0 : i32
    %0 = arith.cmpi eq, %arg1, %c0_i32 : i32
    %1 = arith.extui %0 : i1 to i32
    %c0_i32_0 = arith.constant 0 : i32
    %2 = arith.cmpi ne, %1, %c0_i32_0 : i32
    scf.if %2 {
      %cst_13 = arith.constant 0.000000e+00 : f32
      %21 = vector.broadcast %cst_13 : f32 to vector<128x128xf32>
      %c0_14 = arith.constant 0 : index
      %c0_15 = arith.constant 0 : index
      %22 = vector.load %arg9[%c0_14, %c0_15] : memref<128x128xf32, #tpu.memory_space<vmem>>, vector<128x128xf32>
      tpu.vector_store %arg9[%c0_14, %c0_15], %21 {strides = array<i32>} : memref<128x128xf32, #tpu.memory_space<vmem>>, vector<128x128xf32>,
    } else {
    }
    %c0 = arith.constant 0 : index
    %c0_1 = arith.constant 0 : index
    %c0_2 = arith.constant 0 : index
    %3 = vector.load %arg2[%c0, %c0_1, %c0_2] : memref<1x128x128xbf16, #tpu.memory_space<vmem>>, vector<1x128x128xbf16>
    %4 = vector.shape_cast %3 : vector<1x128x128xbf16> to vector<128x128xbf16>
    %c0_3 = arith.constant 0 : index
    %c0_4 = arith.constant 0 : index
    %5 = vector.load %arg3[%c0_3, %c0_4] : memref<128x256xbf16, #tpu.memory_space<vmem>>, vector<128x256xbf16>
    %cst = arith.constant dense<0.000000e+00> : vector<128x256xf32>
    %6 = tpu.matmul %4, %5, %cst {dimension_numbers = #tpu.dot_dimension_numbers<[1], [0], [0], [1], [0, 0, 1, 1], [], []>} : vector<128x128xbf16>, vector<128x256xbf16>, vector<128x256xf32> -> vector<128x256xf32>
    %c0_5 = arith.constant 0 : index
    %c0_6 = arith.constant 0 : index
    %7 = vector.load %arg4[%c0_5, %c0_6] : memref<1x256xf32, #tpu.memory_space<vmem>>, vector<1x256xf32>
    %8 = vector.broadcast %7 : vector<1x256xf32> to vector<128x256xf32>
    %9 = arith.addf %6, %8 : vector<128x256xf32>
    %10 = vector.extract_strided_slice %9 {offsets = [0, 0], sizes = [128, 128], strides = [1, 1]} : vector<128x256xf32> to vector<128x128xf32>
    %11 = arith.truncf %10 : vector<128x128xf32> to vector<128x128xbf16>
    %12 = vector.extract_strided_slice %9 {offsets = [0, 128], sizes = [128, 128], strides = [1, 1]} : vector<128x256xf32> to vector<128x128xf32>
    %13 = arith.truncf %12 : vector<128x128xf32> to vector<128x128xbf16>
    %c0_7 = arith.constant 0 : index
    %c0_8 = arith.constant 0 : index
    %14 = vector.load %arg9[%c0_7, %c0_8] : memref<128x128xf32, #tpu.memory_space<vmem>>, vector<128x128xf32>
    %cst_9 = arith.constant dense<0.000000e+00> : vector<128x128xf32>
    %15 = tpu.matmul %11, %13, %cst_9 {dimension_numbers = #tpu.dot_dimension_numbers<[0], [0], [1], [1], [0, 1, 1, 1], [], []>} : vector<128x128xbf16>, vector<128x128xbf16>, vector<128x128xf32> -> vector<128x128xf32>
    %16 = arith.addf %14, %15 : vector<128x128xf32>
    %c0_10 = arith.constant 0 : index
    %c0_11 = arith.constant 0 : index
    %17 = vector.load %arg9[%c0_10, %c0_11] : memref<128x128xf32, #tpu.memory_space<vmem>>, vector<128x128xf32>
    tpu.vector_store %arg9[%c0_10, %c0_11], %16 {strides = array<i32>} : memref<128x128xf32, #tpu.memory_space<vmem>>, vector<128x128xf32>,
    %c1_i32 = arith.constant 1 : i32
    %18 = arith.cmpi eq, %arg1, %c1_i32 : i32
    %19 = arith.extui %18 : i1 to i32
    %c0_i32_12 = arith.constant 0 : i32
    %20 = arith.cmpi ne, %19, %c0_i32_12 : i32
    scf.if %20 {
      %c0_13 = arith.constant 0 : index
      %c0_14 = arith.constant 0 : index
      %21 = vector.load %arg9[%c0_13, %c0_14] : memref<128x128xf32, #tpu.memory_space<vmem>>, vector<128x128xf32>
      %c0_15 = arith.constant 0 : index
      %c0_16 = arith.constant 0 : index
      %22 = vector.load %arg5[%c0_15, %c0_16] : memref<128x128xf32, #tpu.memory_space<vmem>>, vector<128x128xf32>
      %cst_17 = arith.constant dense<0.000000e+00> : vector<128x128xf32>
      %23 = tpu.matmul %22, %21, %cst_17 {dimension_numbers = #tpu.dot_dimension_numbers<[1], [0], [0], [1], [0, 0, 1, 1], [], []>} : vector<128x128xf32>, vector<128x128xf32>, vector<128x128xf32> -> vector<128x128xf32>
      %c0_18 = arith.constant 0 : index
      %c0_19 = arith.constant 0 : index
      %24 = vector.load %arg6[%c0_18, %c0_19] : memref<128x128xf32, #tpu.memory_space<vmem>>, vector<128x128xf32>
      %cst_20 = arith.constant dense<0.000000e+00> : vector<128x128xf32>
      %25 = tpu.matmul %23, %24, %cst_20 {dimension_numbers = #tpu.dot_dimension_numbers<[1], [0], [0], [1], [0, 0, 1, 1], [], []>} : vector<128x128xf32>, vector<128x128xf32>, vector<128x128xf32> -> vector<128x128xf32>
      %c0_21 = arith.constant 0 : index
      %c0_22 = arith.constant 0 : index
      %26 = vector.load %arg7[%c0_21, %c0_22] : memref<128x128xf32, #tpu.memory_space<vmem>>, vector<128x128xf32>
      %27 = arith.addf %25, %26 : vector<128x128xf32>
      %c0_23 = arith.constant 0 : index
      %c0_24 = arith.constant 0 : index
      %c0_25 = arith.constant 0 : index
      %28 = vector.load %arg8[%c0_23, %c0_24, %c0_25] : memref<1x128x128xf32, #tpu.memory_space<vmem>>, vector<1x128x128xf32>
      %29 = vector.shape_cast %28 : vector<1x128x128xf32> to vector<128x128xf32>
      %30 = vector.shape_cast %27 : vector<128x128xf32> to vector<1x128x128xf32>
      tpu.vector_store %arg8[%c0_23, %c0_24, %c0_25], %30 {strides = array<i32>} : memref<1x128x128xf32, #tpu.memory_space<vmem>>, vector<1x128x128xf32>,
    } else {
    }
    return
  }
  func.func @transform_0(%arg0: i32, %arg1: i32) -> (i32, i32, i32) {
    %c0_i32 = arith.constant 0 : i32
    %c0_i32_0 = arith.constant 0 : i32
    return %arg0, %arg1, %c0_i32 : i32, i32, i32
  }
  func.func @transform_1(%arg0: i32, %arg1: i32) -> (i32, i32) {
    %c0_i32 = arith.constant 0 : i32
    %c0_i32_0 = arith.constant 0 : i32
    %c0_i32_1 = arith.constant 0 : i32
    return %c0_i32, %c0_i32_0 : i32, i32
  }
  func.func @transform_2(%arg0: i32, %arg1: i32) -> (i32, i32) {
    %c0_i32 = arith.constant 0 : i32
    %c0_i32_0 = arith.constant 0 : i32
    %c0_i32_1 = arith.constant 0 : i32
    return %c0_i32, %c0_i32_0 : i32, i32
  }
  func.func @transform_3(%arg0: i32, %arg1: i32) -> (i32, i32) {
    %c0_i32 = arith.constant 0 : i32
    %c0_i32_0 = arith.constant 0 : i32
    %c0_i32_1 = arith.constant 0 : i32
    return %c0_i32, %c0_i32_0 : i32, i32
  }
  func.func @transform_4(%arg0: i32, %arg1: i32) -> (i32, i32) {
    %c0_i32 = arith.constant 0 : i32
    %c0_i32_0 = arith.constant 0 : i32
    %c0_i32_1 = arith.constant 0 : i32
    return %c0_i32, %c0_i32_0 : i32, i32
  }
  func.func @transform_5(%arg0: i32, %arg1: i32) -> (i32, i32) {
    %c0_i32 = arith.constant 0 : i32
    %c0_i32_0 = arith.constant 0 : i32
    %c0_i32_1 = arith.constant 0 : i32
    return %c0_i32, %c0_i32_0 : i32, i32
  }
  func.func @transform_6(%arg0: i32, %arg1: i32) -> (i32, i32, i32) {
    %c0_i32 = arith.constant 0 : i32
    %c0_i32_0 = arith.constant 0 : i32
    %c0_i32_1 = arith.constant 0 : i32
    return %arg0, %c0_i32, %c0_i32_0 : i32, i32, i32
  }
}

</mosaic_0001>

<bundles_post_ra>
// kernel: tpu_custom_call.1
= control target key start
LH: loop header
LB: loop body
LE: loop exit
PB: predicated region body
PF: predicated region fallthrough
CT: control target
= control target key end

     0   :  { %s2177_s0 = inlined_call_operand.hbm [shape: bf16[2,256,128], index: 0, kind: input, shape index: {}]   ;;  %s2178_s1 = inlined_call_operand.hbm [shape: bf16[128,256], index: 1, kind: input, shape index: {}]   ;;  %s2179_s2 = inlined_call_operand.hbm [shape: f32[1,256], index: 2, kind: input, shape index: {}]   ;;  %s2180_s3 = inlined_call_operand.hbm [shape: f32[128,128], index: 3, kind: input, shape index: {}]   ;;  %s2181_s4 = inlined_call_operand.hbm [shape: f32[128,128], index: 4, kind: input, shape index: {}]   ;;  %s2182_s5 = inlined_call_operand.hbm [shape: f32[128,128], index: 5, kind: input, shape index: {}]   ;;  %s2183_s6 = inlined_call_operand.hbm [shape: f32[2,128,128], index: 6, kind: output, shape index: {}]  }
   0x1   :  { %2188 = sst [smem:[#allocation25_spill]] %s2178_s1 }
   0x2   :  { %2189 = sst [smem:[#allocation26_spill]] %s2179_s2 }
   0x3   :  { %2190 = sst [smem:[#allocation27_spill]] %s2180_s3 }
   0x4   :  { %2191 = sst [smem:[#allocation28_spill]] %s2181_s4 }
   0x5   :  { %2192 = sst [smem:[#allocation29_spill]] %s2182_s5 }
   0x6   :  { %2193 = sst [smem:[#allocation30_spill]] %s2183_s6 }
   0x7   :  { %11 = vsyncpa [#allocation4], 0 }
   0x8   :  { %13 = vsyncpa [#allocation4 + $0x1], 0 }
   0x9   :  { %14 = vsyncpa [#allocation7], 0 }
   0xa   :  { %15 = vsyncpa [#allocation10], 0 }
   0xb   :  { %16 = vsyncpa [#allocation13], 0 }
   0xc   :  { %17 = vsyncpa [#allocation5], 0 }
   0xd   :  { %19 = vsyncpa [#allocation5 + $0x1], 0  ;;  %s1876_s21 = smov 0   ;;  %s1878_s22 = smov 0  }
   0xe   :  { %s1880_s23 = smov 0   ;;  %s1882_s24 = smov 0  }
   0xf   :  { %s1884_s25 = smov 0   ;;  %s1886_s26 = smov 0  }
  0x10   :  { %s1888_s27 = smov 0   ;;  %s1890_s28 = smov 0  }
  0x11   :  { %s1892_s29 = smov 0   ;;  %s1894_s30 = smov 0  }
  0x12   :  { %s1896_s7 = smov 0  }
  0x13 LB: > { %2194 = sst [smem:[#allocation20_spill]] %s1811_s27  ;;  %s1148_s8 = sadd.s32 4294967295, %s1827_s7   ;;  %s1827_s7 = sphi %s1896_s7, %s25_s7   ;;  %s1823_s30 = sphi %s1894_s30, %s2226_s30   ;;  %s1819_s29 = sphi %s1892_s29, %s2217_s29   ;;  %s1815_s28 = sphi %s1890_s28, %s2225_s28   ;;  %s1811_s27 = sphi %s1888_s27, %s2216_s27   ;;  %s1807_s26 = sphi %s1886_s26, %s2224_s26   ;;  %s1803_s25 = sphi %s1884_s25, %s2223_s25   ;;  %s1799_s24 = sphi %s1882_s24, %s2222_s24   ;;  %s1795_s23 = sphi %s1880_s23, %s2221_s23   ;;  %s1791_s22 = sphi %s1878_s22, %s2220_s22   ;;  %s1787_s21 = sphi %s1876_s21, %s2219_s21  }
  0x14   : > { %2195 = sst [smem:[#allocation21_spill]] %s1815_s28  ;;  %p1150_p0 = scmp.ge.s32.totalorder %s1827_s7, 1 }
  0x15   : > { %2196 = sst [smem:[#allocation22_spill]] %s1819_s29  ;;  %p1933_p1 = scmp.eq.s32.totalorder %s1148_s8, 0 }
  0x16   : > { %p1937_p2 = scmp.eq.s32.totalorder %s1148_s8, 3  ;;  %p201_p3 = scmp.lt.s32.totalorder %s1827_s7, 5 }
  0x17   : > { %s2199_s1 = sld [smem:[#allocation25_spill]]  ;;  %s1829_s15 = smov [#allocation6]  }
  0x18   : > { %p1945_p4 = pnand %p1150_p0, %p201_p3  ;;  %s214_s16 = sshll.u32 %s1829_s15, 4  ;;  %s215_s16 = int_to_ptr.vmem [resolvable:$true] %s214_s16 }
  0x19   : > { %s2202_s3 = sld [smem:[#allocation27_spill]]  ;;  %s1830_s8 = smov [#allocation9]  }
  0x1a   : > { %p1377_p5 = pneg %p1945_p4  ;;  %s240_s11 = sshll.u32 %s1830_s8, 4  ;;  %s241_s11 = int_to_ptr.vmem [resolvable:$true] %s240_s11 }
  0x1b   : > { %s1831_s12 = smov 128   ;;  %s1832_s15 = smov 8  }
  0x1c   : > { %p1953_p6 = pnand %p1377_p5, %p1933_p1  ;;  %s2203_s2 = sld [smem:[#allocation26_spill]] }
  0x1d   : > { %s212_s13 = sshll.u32 %s2199_s1, 4  ;;  %s1833_s18 = smov [#allocation8]   ;;  %s213_s13 = int_to_ptr.hbm [resolvable:$true] %s212_s13 }
  0x1e   : > { %1380 = dma.hbm_to_vmem [thread:$0]  (!%p1953_p6), %s213_s13, 2048, %s215_s16, [#allocation7], %s1831_s12, %s1831_s12, %s1832_s15  }
  0x1f   : > { %s238_s20 = sshll.u32 %s2202_s3, 4  ;;  %s229_s19 = sshll.u32 %s1833_s18, 4  ;;  %s239_s20 = int_to_ptr.hbm [resolvable:$true] %s238_s20  ;;  %s230_s19 = int_to_ptr.vmem [resolvable:$true] %s229_s19 }
  0x20   : > { %1386 = dma.hbm_to_vmem [thread:$0]  (!%p1953_p6), %s239_s20, 2048, %s241_s11, [#allocation10], %s1831_s12, %s1831_s12, %s1832_s15  }
  0x21   : > { %s2204_s4 = sld [smem:[#allocation28_spill]]  ;;  %s1834_s16 = smov [#allocation11]  }
  0x22   : > { %s227_s28 = sshll.u32 %s2203_s2, 4  ;;  %s2205_s5 = sld [smem:[#allocation29_spill]]  ;;  %s228_s28 = int_to_ptr.hbm [resolvable:$true] %s227_s28 }
  0x23   : > { %1383 = dma.hbm_to_vmem [thread:$0]  (!%p1953_p6), %s228_s28, 32, %s230_s19, [#allocation7]  }
  0x24   : > { %s254_s20 = sshll.u32 %s1834_s16, 4  ;;  %s1835_s3 = smov [#allocation12]   ;;  %s255_s20 = int_to_ptr.vmem [resolvable:$true] %s254_s20 }
  0x25   : > { %s268_s27 = sshll.u32 %s1835_s3, 4  ;;  %s1149_s28 = sadd.s32 4294967294, %s1827_s7   ;;  %s269_s27 = int_to_ptr.vmem [resolvable:$true] %s268_s27 }
  0x26   : > { %s34_s11 = sadd.s32 1, %s1819_s29  ;;  %s37_s18 = sadd.s32 1, %s1823_s30 }
  0x27   : > { %s252_s8 = sshll.u32 %s2204_s4, 4  ;;  %p35_p7 = scmp.ge.s32.totalorder %s34_s11, 2  ;;  %s253_s8 = int_to_ptr.hbm [resolvable:$true] %s252_s8 }
  0x28   : > { %s266_s13 = sshll.u32 %s2205_s5, 4  ;;  %s46_s19 = sadd.s32 1, %s1807_s26  ;;  %s267_s13 = int_to_ptr.hbm [resolvable:$true] %s266_s13 }
  0x29   : > { %1389 = dma.hbm_to_vmem [thread:$0]  (!%p1953_p6), %s253_s8, 2048, %s255_s20, [#allocation10], %s1831_s12, %s1831_s12, %s1832_s15  }
  0x2a   : > { %1392 = dma.hbm_to_vmem [thread:$0]  (!%p1953_p6), %s267_s13, 2048, %s269_s27, [#allocation13], %s1831_s12, %s1831_s12, %s1832_s15  }
  0x2b   : > { %p53_p8 = scmp.ne.s32.totalorder %s1807_s26, %s1803_s25  ;;  %s2228_s11 = smov (%p35_p7, %s34_s11), 0 }
  0x2c   : > { %2206 = sst [smem:[#allocation23_spill]] %s2228_s11  ;;  %s2230_s18 = smov (!%p35_p7, %s37_s18), %s1823_s30 }
  0x2d   : > { %s42_s17 = ssub.s32 %s1819_s29, %s2228_s11  ;;  %p54_p9 = scmp.eq.s32.totalorder %s1827_s7, 0 }
  0x2e   : > { %p39_p10 = scmp.ge.s32.totalorder %s2230_s18, 2  ;;  %p59_p11 = scmp.ne.s32.totalorder %s1803_s25, %s1799_s24 }
  0x2f   : > { %p1993_p12 = por %p54_p9, %p53_p8  ;;  %s177_s15 = sadd.s32 1, %s1795_s23 }
  0x30   : > { %s2232_s18 = smov (%p39_p10, %s2230_s18), 0  ;;  %p2002_p13 = por %p1933_p1, %p59_p11 }
  0x31   : > { %2208 = sst [smem:[#allocation24_spill]] %s2232_s18  ;;  %p187_p0 = scmp.ne.s32.totalorder %s1795_s23, %s1791_s22 }
  0x32   : > { %s41_s1 = ssub.s32 %s1823_s30, %s2232_s18  ;;  %p193_p3 = scmp.ne.s32.totalorder %s1791_s22, %s1787_s21 }
  0x33   : > { %s43_s24 = sor.u32 %s42_s17, %s41_s1  ;;  %p175_p5 = scmp.eq.s32.totalorder %s41_s1, 0 }
  0x34   : > { %p44_p6 = scmp.eq.s32.totalorder %s43_s24, 0  ;;  %p2014_p7 = por %p1937_p2, %p187_p0 }
  0x35   : > { %s2019_s13 = scalar_select %p175_p5, %s1795_s23, %s177_s15  }
  0x36   : > { %s2022_s16 = scalar_select %p44_p6, %s1807_s26, %s46_s19  }
  0x37   : > { %p194_p8 = scmp.eq.s32.totalorder %s1149_s28, 3  ;;  %p1406_p9 = scmp.lt.s32.totalorder %s1827_s7, 4 }
  0x38   : > { %s282_s20 = sand.u32 1, %s1807_s26   ;;  %s1158_s3 = sshll.u32 %s1819_s29, 4 }
  0x39   : > { %p2027_p10 = por %p194_p8, %p193_p3  ;;  %s1157_s17 = sshll.u32 %s282_s20, 6 }
  0x3a   : > { %s1159_s10 = sshll.u32 %s1823_s30, 5  ;;  %s286_s2 = scalar_lea.vmem [#allocation3], %s1157_s17 }
  0x3b   : > { %s291_s1 = sadd.s32 %s1159_s10, %s1158_s3  ;;  %s296_s4 = sshll.u32 %s286_s2, 4  ;;  %s297_s4 = int_to_ptr.vmem [resolvable:$true] %s296_s4 }
  0x3c   : > { %s1160_s24 = sshll.u32 %s291_s1, 2  ;;  %p1394_p2 = pnand %p1406_p9, %p1993_p12 }
  0x3d   : > { %s293_s18 = scalar_lea.hbm %s2177_s0, %s1160_s24  ;;  %s283_s28 = scalar_lea.sflag [#allocation4], %s282_s20 }
  0x3e   : > { %s294_s19 = sshll.u32 %s293_s18, 4  ;;  %s1836_s11 = smov 64   ;;  %s295_s19 = int_to_ptr.hbm [resolvable:$true] %s294_s19 }
  0x3f   : > { %s1837_s29 = smov 4   ;;  %308 = sbr.rel (%p1945_p4) target bundleno = 1088 (0x440), region = 44 }
  0x40   : > { %1396 = dma.hbm_to_vmem [thread:$0]  (!%p1394_p2), %s295_s19, 1024, %s297_s4, %s283_s28, %s1836_s11, %s1836_s11, %s1837_s29  }
  0x41   : > { %s310_s2 = sand.u32 (!%p1945_p4), 1, %s1803_s25  }
  0x42   : > { %s1162_s3 = sshll.u32 (!%p1945_p4), %s310_s2, 6  ;;  %s311_s17 = scalar_lea.sflag (!%p1945_p4), [#allocation4], %s310_s2 }
  0x43   : > { %s2042_s5 = scalar_lea.vmem (!%p1945_p4), [#allocation3], %s1162_s3 }
  0x44   : > { %1766 = dma.done.wait (%p2002_p13), %s311_s17, 1024  }
  0x45   : > { %1768 = vsyncadd (%p2002_p13), %s311_s17, 4294966272 }
  0x46   : > { %1770 = dma.done.wait (%p1933_p1), [#allocation7], 2080  }
  0x47   : > { %1772 = vsyncadd (%p1933_p1), [#allocation7], 4294965216 }
  0x48   : > { %1774 = dma.done.wait (%p1933_p1), [#allocation10], 4096  }
  0x49   : > { %1776 = vsyncadd (%p1933_p1), [#allocation10], 4294963200 }
  0x4a   : > { %1778 = dma.done.wait (%p1933_p1), [#allocation13], 2048  }
  0x4b   : > { %1780 = vsyncadd (%p1933_p1), [#allocation13], 4294965248  ;;  %s366_s4 = sand.u32 1, %s1791_s22   ;;  %s2212_s11 = sld [smem:[#allocation20_spill]] }
  0x4c   : > { %s1168_s29 = sshll.u32 %s366_s4, 7 }
  0x4d   : > { %s2063_s14 = scalar_lea.vmem [#allocation14], %s1168_s29 }
  0x51   : > { %p1169_p4 = scmp.ne.s32.totalorder %s2212_s11, 0 }
  0x53   : > { %373 = sbr.rel (%p1169_p4) target bundleno = 105 (0x69), region = 72 }
  0x58   : > { %v1838_v0 = vmov 0.0  }
  0x59   : > { %374 = vst [vmem:[#allocation2 + $0x30] sm:$0xff] %v1838_v0 }
  0x5a   : > { %375 = vst [vmem:[#allocation2] sm:$0xff] %v1838_v0 }
  0x5b   : > { %376 = vst [vmem:[#allocation2 + $0x58] sm:$0xff] %v1838_v0 }
  0x5c   : > { %377 = vst [vmem:[#allocation2 + $0x18] sm:$0xff] %v1838_v0 }
  0x5d   : > { %378 = vst [vmem:[#allocation2 + $0x50] sm:$0xff] %v1838_v0 }
  0x5e   : > { %379 = vst [vmem:[#allocation2 + $0x68] sm:$0xff] %v1838_v0 }
  0x5f   : > { %380 = vst [vmem:[#allocation2 + $0x8] sm:$0xff] %v1838_v0 }
  0x60   : > { %381 = vst [vmem:[#allocation2 + $0x48] sm:$0xff] %v1838_v0 }
  0x61   : > { %382 = vst [vmem:[#allocation2 + $0x40] sm:$0xff] %v1838_v0 }
  0x62   : > { %383 = vst [vmem:[#allocation2 + $0x20] sm:$0xff] %v1838_v0 }
  0x63   : > { %384 = vst [vmem:[#allocation2 + $0x10] sm:$0xff] %v1838_v0 }
  0x64   : > { %385 = vst [vmem:[#allocation2 + $0x38] sm:$0xff] %v1838_v0 }
  0x65   : > { %386 = vst [vmem:[#allocation2 + $0x60] sm:$0xff] %v1838_v0 }
  0x66   : > { %387 = vst [vmem:[#allocation2 + $0x70] sm:$0xff] %v1838_v0 }
  0x67   : > { %388 = vst [vmem:[#allocation2 + $0x78] sm:$0xff] %v1838_v0 }
  0x68   : > { %389 = vst [vmem:[#allocation2 + $0x28] sm:$0xff] %v1838_v0 }
  0x69 PF: > { %v1260_v1 = vld [vmem:[#allocation6 + $0x70] sm:$0xf]  ;;  %v1295_v2 = vld [vmem:[#allocation6 + $0x74] sm:$0xf0]  ;;  %v1294_v3 = vld [vmem:[#allocation6 + $0x74] sm:$0xf] }
  0x6a   : > { %v1261_v4 = vor.u32 %v1295_v2, %v1260_v1  ;;  %v1262_v5 = vld [vmem:[#allocation6 + $0x78] sm:$0xf0]  ;;  %v1252_v6 = vld [vmem:[#allocation6 + $0x60] sm:$0xf]  ;;  %v1293_v7 = vld [vmem:[#allocation6 + $0x64] sm:$0xf0] }
  0x6b   : > { %v2066_v8 = vor.u32 %v1294_v3, %v1262_v5  ;;  %v1292_v9 = vld [vmem:[#allocation6 + $0x64] sm:$0xf]  ;;  %v1254_v10 = vld [vmem:[#allocation6 + $0x68] sm:$0xf0]  ;;  %v1253_v11 = vor.u32 %v1293_v7, %v1252_v6  ;;  %v1244_v13 = vld [vmem:[#allocation6 + $0x50] sm:$0xf] }
  0x6c   : > { %556 = vmatpush.bf16.msra.mxu0 %v1261_v4  ;;  %1297 = vmatpush.bf16.msra.mxu3 %v1261_v4  ;;  %v2069_v12 = vor.u32 %v1292_v9, %v1254_v10  ;;  %v1291_v14 = vld [vmem:[#allocation6 + $0x54] sm:$0xf0]  ;;  %v1290_v15 = vld [vmem:[#allocation6 + $0x54] sm:$0xf]  ;;  %v1246_v16 = vld [vmem:[#allocation6 + $0x58] sm:$0xf0] }
  0x6d   : > { %605 = vmatpush.bf16.msra.mxu1 %v2066_v8  ;;  %v1245_v17 = vor.u32 %v1291_v14, %v1244_v13  ;;  %v1249_v18 = vor.u32 %v1290_v15, %v1246_v16  ;;  %v1236_v19 = vld [vmem:[#allocation6 + $0x40] sm:$0xf]  ;;  %v1289_v20 = vld [vmem:[#allocation6 + $0x44] sm:$0xf0]  ;;  %v1288_v21 = vld [vmem:[#allocation6 + $0x44] sm:$0xf] }
  0x6e   : > { %v1238_v22 = vld [vmem:[#allocation6 + $0x48] sm:$0xf0]  ;;  %v1237_v23 = vor.u32 %v1289_v20, %v1236_v19  ;;  %v1228_v25 = vld [vmem:[#allocation6 + $0x30] sm:$0xf]  ;;  %v1287_v26 = vld [vmem:[#allocation6 + $0x34] sm:$0xf0] }
  0x6f   : > { %v1241_v24 = vor.u32 %v1288_v21, %v1238_v22  ;;  %v1286_v27 = vld [vmem:[#allocation6 + $0x34] sm:$0xf]  ;;  %v1230_v28 = vld [vmem:[#allocation6 + $0x38] sm:$0xf0]  ;;  %v1229_v29 = vor.u32 %v1287_v26, %v1228_v25  ;;  %v1220_v31 = vld [vmem:[#allocation6 + $0x20] sm:$0xf] }
  0x70   : > { %557 = vmatpush.bf16.msra.mxu0 %v1253_v11  ;;  %1298 = vmatpush.bf16.msra.mxu3 %v1253_v11  ;;  %v1233_v30 = vor.u32 %v1286_v27, %v1230_v28  ;;  %v1285_v32 = vld [vmem:[#allocation6 + $0x24] sm:$0xf0]  ;;  %v1284_v33 = vld [vmem:[#allocation6 + $0x24] sm:$0xf]  ;;  %v1222_v34 = vld [vmem:[#allocation6 + $0x28] sm:$0xf0] }
  0x71   : > { %606 = vmatpush.bf16.msra.mxu1 %v2069_v12  ;;  %v1221_v35 = vor.u32 %v1285_v32, %v1220_v31  ;;  %v1225_v36 = vor.u32 %v1284_v33, %v1222_v34  ;;  %v1212_v37 = vld [vmem:[#allocation6 + $0x10] sm:$0xf]  ;;  %v1283_v38 = vld [vmem:[#allocation6 + $0x14] sm:$0xf0]  ;;  %v1282_v39 = vld [vmem:[#allocation6 + $0x14] sm:$0xf] }
  0x72   : > { %v1214_v40 = vld [vmem:[#allocation6 + $0x18] sm:$0xf0]  ;;  %v1213_v41 = vor.u32 %v1283_v38, %v1212_v37  ;;  %v1204_v43 = vld [vmem:[#allocation6] sm:$0xf]  ;;  %v1281_v44 = vld [vmem:[#allocation6 + $0x4] sm:$0xf0] }
  0x73   : > { %v1217_v42 = vor.u32 %v1282_v39, %v1214_v40  ;;  %v1280_v45 = vld [vmem:[#allocation6 + $0x4] sm:$0xf]  ;;  %v1206_v46 = vld [vmem:[#allocation6 + $0x8] sm:$0xf0]  ;;  %v1205_v47 = vor.u32 %v1281_v44, %v1204_v43  ;;  %v1278_v50 = vld [vmem:[%s2042_s5 + $0x30] sm:$0xff]  ;;  %s2213_s9 = sld [smem:[#allocation20_spill]] }
  0x74   : > { %558 = vmatpush.bf16.msra.mxu0 %v1245_v17  ;;  %1299 = vmatpush.bf16.msra.mxu3 %v1245_v17  ;;  %v1209_v48 = vor.u32 %v1280_v45, %v1206_v46  ;;  %v1272_v49 = vld [vmem:[%s2042_s5] sm:$0xff]  ;;  %v1273_v51 = vld [vmem:[%s2042_s5 + $0x8] sm:$0xff]  ;;  %v1279_v52 = vld [vmem:[%s2042_s5 + $0x38] sm:$0xff] }
  0x75   : > { %607 = vmatpush.bf16.msra.mxu1 %v1249_v18  ;;  %v1274_v53 = vld [vmem:[%s2042_s5 + $0x10] sm:$0xff]  ;;  %v1275_v54 = vld [vmem:[%s2042_s5 + $0x18] sm:$0xff]  ;;  %v1276_v55 = vld [vmem:[%s2042_s5 + $0x20] sm:$0xff] }
  0x76   : > { %v1277_v56 = vld [vmem:[%s2042_s5 + $0x28] sm:$0xff]  ;;  %v422_v59 = vld [vmem:[#allocation8] sm:$0x3] }
  0x77   : > { %v2082_v60 = vperm.slane %v422_v59, 0  ;;  %v425_v26 = vperm.slane %v422_v59, 1 }
  0x78   : > { %559 = vmatpush.bf16.msra.mxu0 %v1237_v23  ;;  %1300 = vmatpush.bf16.msra.mxu3 %v1237_v23 }
  0x79   : > { %608 = vmatpush.bf16.msra.mxu1 %v1241_v24  ;;  %p1266_p1 = scmp.ne.s32.totalorder %s2213_s9, 1 }
  0x7c   : > { %560 = vmatpush.bf16.msra.mxu0 %v1229_v29  ;;  %1301 = vmatpush.bf16.msra.mxu3 %v1229_v29 }
  0x7d   : > { %609 = vmatpush.bf16.msra.mxu1 %v1233_v30 }
  0x80   : > { %561 = vmatpush.bf16.msra.mxu0 %v1221_v35  ;;  %1302 = vmatpush.bf16.msra.mxu3 %v1221_v35 }
  0x81   : > { %610 = vmatpush.bf16.msra.mxu1 %v1225_v36 }
  0x84   : > { %562 = vmatpush.bf16.msra.mxu0 %v1213_v41  ;;  %1303 = vmatpush.bf16.msra.mxu3 %v1213_v41 }
  0x85   : > { %611 = vmatpush.bf16.msra.mxu1 %v1217_v42 }
  0x88   : > { %563 = vmatpush.bf16.msra.mxu0 %v1205_v47  ;;  %1304 = vmatpush.bf16.msra.mxu3 %v1205_v47 }
  0x89   : > { %612 = vmatpush.bf16.msra.mxu1 %v1209_v48 }
  0x8b   : > { %564 = vmatmul.bf16.vlgmr.msra.gmra.mxu0 %v1272_v49  ;;  %594 = vmatmul.bf16.vlgmr.msra.gmra.mxu3 %v1278_v50 }
  0x8c   : > { %1305 = vmatpush.bf16.msrb.mxu3 %v2066_v8  ;;  %613 = vmatmul.bf16.vlgmr.msra.gmra.mxu1 %v1272_v49 }
  0x90   : > { %1306 = vmatpush.bf16.msrb.mxu3 %v2069_v12 }
  0x94   : > { %1307 = vmatpush.bf16.msrb.mxu3 %v1249_v18 }
  0x98   : > { %1308 = vmatpush.bf16.msrb.mxu3 %v1241_v24 }
  0x9b   : > { %569 = vmatmul.bf16.gmra.mxu0 %v1273_v51  ;;  %599 = vmatmul.bf16.gmra.mxu3 %v1279_v52 }
  0x9c   : > { %1309 = vmatpush.bf16.msrb.mxu3 %v1233_v30  ;;  %618 = vmatmul.bf16.gmra.mxu1 %v1273_v51 }
  0xa0   : > { %1310 = vmatpush.bf16.msrb.mxu3 %v1225_v36 }
  0xa4   : > { %1311 = vmatpush.bf16.msrb.mxu3 %v1217_v42 }
  0xa8   : > { %1312 = vmatpush.bf16.msrb.mxu3 %v1209_v48 }
  0xab   : > { %574 = vmatmul.bf16.gmra.mxu0 %v1274_v53  ;;  %643 = vmatmul.bf16.vlgmr.msrb.gmra.mxu3 %v1278_v50 }
  0xac   : > { %623 = vmatmul.bf16.gmra.mxu1 %v1274_v53 }
  0xbb   : > { %579 = vmatmul.bf16.gmra.mxu0 %v1275_v54  ;;  %648 = vmatmul.bf16.gmra.mxu3 %v1279_v52 }
  0xbc   : > { %628 = vmatmul.bf16.gmra.mxu1 %v1275_v54 }
  0xcb   : > { %584 = vmatmul.bf16.gmra.mxu0 %v1276_v55 }
  0xcc   : > { %633 = vmatmul.bf16.gmra.mxu1 %v1276_v55 }
  0xdb   : > { %589 = vmatmul.bf16.gmra.mxu0 %v1277_v56 }
  0xdc   : > { %638 = vmatmul.bf16.gmra.mxu1 %v1277_v56 }
 0x108   : > { %v565_v57 = vpop.f32.mrf.mxu0 }
 0x109   : > { %v614_v58 = vpop.f32.mrf.mxu1  ;;  %v566_v63 = vadd.f32 %v565_v57, %v2082_v60 }
 0x10a   : > { %v615_v43 = vadd.f32 %v614_v58, %v425_v26 }
 0x10e   : > { %v595_v61 = vpop.f32.mrf.mxu3 }
 0x10f   : > { %v596_v36 = vadd.f32 %v595_v61, %v2082_v60 }
 0x110   : > { %v567_v62 = vpop.f32.mrf.mxu0 }
 0x111   : > { %v568_v0 = vadd.f32 %v567_v62, %v2082_v60  ;;  %v616_v1 = vpop.f32.mrf.mxu1 }
 0x112   : > { %v617_v44 = vadd.f32 %v616_v1, %v425_v26 }
 0x113   : > { %v654_v2 = vpack.c.bf16 %v568_v0, %v566_v63 }
 0x114   : > { %v662_v51 = vpack.c.bf16 %v617_v44, %v615_v43  ;;  %v678_v44 = vld [vmem:[#allocation2 + $0x40] sm:$0xff] }
 0x115   : > { %686 = vxpose.xlu0.c.b16.start [1/8] %v654_v2, 128 }
 0x116   : > { %v597_v3 = vpop.f32.mrf.mxu3 }
 0x117   : > { %v598_v37 = vadd.f32 %v597_v3, %v2082_v60 }
 0x118   : > { %v570_v4 = vpop.f32.mrf.mxu0 }
 0x119   : > { %v619_v5 = vpop.f32.mrf.mxu1  ;;  %v571_v8 = vadd.f32 %v570_v4, %v2082_v60  ;;  %v660_v42 = vpack.c.bf16 %v598_v37, %v596_v36 }
 0x11a   : > { %v620_v45 = vadd.f32 %v619_v5, %v425_v26 }
 0x11e   : > { %v600_v6 = vpop.f32.mrf.mxu3 }
 0x11f   : > { %v601_v54 = vadd.f32 %v600_v6, %v2082_v60 }
 0x120   : > { %v572_v7 = vpop.f32.mrf.mxu0 }
 0x121   : > { %v573_v9 = vadd.f32 %v572_v7, %v2082_v60  ;;  %v621_v10 = vpop.f32.mrf.mxu1 }
 0x122   : > { %v622_v46 = vadd.f32 %v621_v10, %v425_v26 }
 0x123   : > { %v655_v11 = vpack.c.bf16 %v573_v9, %v571_v8 }
 0x124   : > { %v663_v53 = vpack.c.bf16 %v622_v46, %v620_v45 }
 0x125   : > { %687 = vxpose.xlu0.c.b16.cont [2/8] %v655_v11, 128 }
 0x126   : > { %v602_v12 = vpop.f32.mrf.mxu3 }
 0x127   : > { %v603_v55 = vadd.f32 %v602_v12, %v2082_v60 }
 0x128   : > { %v575_v13 = vpop.f32.mrf.mxu0 }
 0x129   : > { %v2088_v14 = vpop.f32.mrf.mxu1  ;;  %v576_v17 = vadd.f32 %v575_v13, %v2082_v60  ;;  %v661_v58 = vpack.c.bf16 %v603_v55, %v601_v54 }
 0x12a   : > { %v625_v9 = vadd.f32 %v2088_v14, %v425_v26 }
 0x12e   : > { %v644_v15 = vpop.f32.mrf.mxu3 }
 0x12f   : > { %v645_v33 = vadd.f32 %v644_v15, %v425_v26 }
 0x130   : > { %v577_v16 = vpop.f32.mrf.mxu0 }
 0x131   : > { %v578_v18 = vadd.f32 %v577_v16, %v2082_v60  ;;  %v2092_v19 = vpop.f32.mrf.mxu1 }
 0x132   : > { %v627_v10 = vadd.f32 %v2092_v19, %v425_v26 }
 0x133   : > { %v656_v20 = vpack.c.bf16 %v578_v18, %v576_v17 }
 0x135   : > { %688 = vxpose.xlu0.c.b16.cont [3/8] %v656_v20, 128  ;;  %v670_v20 = vld [vmem:[#allocation2 + $0x30] sm:$0xff] }
 0x136   : > { %v646_v21 = vpop.f32.mrf.mxu3 }
 0x137   : > { %v647_v34 = vadd.f32 %v646_v21, %v425_v26 }
 0x138   : > { %v580_v22 = vpop.f32.mrf.mxu0 }
 0x139   : > { %v629_v23 = vpop.f32.mrf.mxu1  ;;  %v581_v27 = vadd.f32 %v580_v22, %v2082_v60  ;;  %v668_v41 = vpack.c.bf16 %v647_v34, %v645_v33 }
 0x13a   : > { %v630_v7 = vadd.f32 %v629_v23, %v425_v26  ;;  %v671_v23 = vld [vmem:[#allocation2] sm:$0xff] }
 0x13e   : > { %v649_v24 = vpop.f32.mrf.mxu3 }
 0x13f   : > { %v650_v31 = vadd.f32 %v649_v24, %v425_v26 }
 0x140   : > { %v582_v25 = vpop.f32.mrf.mxu0 }
 0x141   : > { %v583_v28 = vadd.f32 %v582_v25, %v2082_v60  ;;  %v631_v29 = vpop.f32.mrf.mxu1 }
 0x142   : > { %v632_v6 = vadd.f32 %v631_v29, %v425_v26  ;;  %v673_v29 = vld [vmem:[#allocation2 + $0x18] sm:$0xff] }
 0x143   : > { %v657_v30 = vpack.c.bf16 %v583_v28, %v581_v27 }
 0x144   : > { %v665_v11 = vpack.c.bf16 %v632_v6, %v630_v7 }
 0x145   : > { %689 = vxpose.xlu0.c.b16.cont [4/8] %v657_v30, 128 }
 0x146   : > { %v651_v32 = vpop.f32.mrf.mxu3 }
 0x147   : > { %v652_v35 = vadd.f32 %v651_v32, %v425_v26  ;;  %v674_v32 = vld [vmem:[#allocation2 + $0x50] sm:$0xff] }
 0x148   : > { %v585_v38 = vpop.f32.mrf.mxu0 }
 0x149   : > { %v634_v39 = vpop.f32.mrf.mxu1  ;;  %v669_v40 = vpack.c.bf16 %v652_v35, %v650_v31  ;;  %v586_v48 = vadd.f32 %v585_v38, %v2082_v60  ;;  %v675_v35 = vld [vmem:[#allocation2 + $0x68] sm:$0xff] }
 0x14a   : > { %v635_v1 = vadd.f32 %v634_v39, %v425_v26  ;;  %v676_v38 = vld [vmem:[#allocation2 + $0x8] sm:$0xff] }
 0x14b   : > { %702 = vmatpush.bf16.msra.mxu2 %v669_v40  ;;  %1313 = vmatpush.bf16.msra.mxu3 %v669_v40 }
 0x14f   : > { %703 = vmatpush.bf16.msra.mxu2 %v668_v41  ;;  %1314 = vmatpush.bf16.msra.mxu3 %v668_v41  ;;  %v677_v41 = vld [vmem:[#allocation2 + $0x48] sm:$0xff] }
 0x150   : > { %v587_v47 = vpop.f32.mrf.mxu0 }
 0x151   : > { %v588_v49 = vadd.f32 %v587_v47, %v2082_v60  ;;  %v636_v50 = vpop.f32.mrf.mxu1  ;;  %v679_v47 = vld [vmem:[#allocation2 + $0x20] sm:$0xff] }
 0x152   : > { %v637_v2 = vadd.f32 %v636_v50, %v425_v26  ;;  %v680_v50 = vld [vmem:[#allocation2 + $0x10] sm:$0xff] }
 0x153   : > { %v658_v52 = vpack.c.bf16 %v588_v49, %v586_v48 }
 0x154   : > { %v666_v8 = vpack.c.bf16 %v637_v2, %v635_v1  ;;  %v685_v2 = vld [vmem:[#allocation2 + $0x28] sm:$0xff] }
 0x155   : > { %690 = vxpose.xlu0.c.b16.cont [5/8] %v658_v52, 128 }
 0x158   : > { %v590_v56 = vpop.f32.mrf.mxu0 }
 0x159   : > { %v639_v57 = vpop.f32.mrf.mxu1  ;;  %v591_v62 = vadd.f32 %v590_v56, %v2082_v60  ;;  %v682_v56 = vld [vmem:[#allocation2 + $0x60] sm:$0xff] }
 0x15a   : > { %v640_v59 = vadd.f32 %v639_v57, %v425_v26 }
 0x160   : > { %v592_v61 = vpop.f32.mrf.mxu0 }
 0x161   : > { %v593_v63 = vadd.f32 %v592_v61, %v2082_v60  ;;  %v641_v0 = vpop.f32.mrf.mxu1  ;;  %v664_v60 = vpack.c.bf16 %v627_v10, %v625_v9 }
 0x162   : > { %v642_v3 = vadd.f32 %v641_v0, %v425_v26  ;;  %v672_v26 = vld [vmem:[#allocation2 + $0x58] sm:$0xff] }
 0x163   : > { %v659_v4 = vpack.c.bf16 %v593_v63, %v591_v62  ;;  %v684_v63 = vld [vmem:[#allocation2 + $0x78] sm:$0xff] }
 0x164   : > { %v667_v5 = vpack.c.bf16 %v642_v3, %v640_v59  ;;  %v683_v59 = vld [vmem:[#allocation2 + $0x70] sm:$0xff] }
 0x165   : > { %691 = vxpose.xlu0.c.b16.cont [6/8] %v659_v4, 128 }
 0x166   : > { %704 = vmatpush.bf16.msra.mxu2 %v667_v5  ;;  %1315 = vmatpush.bf16.msra.mxu3 %v667_v5 }
 0x16a   : > { %705 = vmatpush.bf16.msra.mxu2 %v666_v8  ;;  %1316 = vmatpush.bf16.msra.mxu3 %v666_v8 }
 0x16e   : > { %706 = vmatpush.bf16.msra.mxu2 %v665_v11  ;;  %1317 = vmatpush.bf16.msra.mxu3 %v665_v11 }
 0x172   : > { %707 = vmatpush.bf16.msra.mxu2 %v664_v60  ;;  %1318 = vmatpush.bf16.msra.mxu3 %v664_v60 }
 0x175   : > { %692 = vxpose.xlu0.c.b16.cont [7/8] %v660_v42, 128 }
 0x176   : > { %708 = vmatpush.bf16.msra.mxu2 %v663_v53  ;;  %1319 = vmatpush.bf16.msra.mxu3 %v663_v53  ;;  %v681_v53 = vld [vmem:[#allocation2 + $0x38] sm:$0xff] }
 0x17a   : > { %709 = vmatpush.bf16.msra.mxu2 %v662_v51  ;;  %1320 = vmatpush.bf16.msra.mxu3 %v662_v51 }
 0x185   : > { %693 = vxpose.xlu0.c.b16.end [8/8] %v661_v58, 128 }
 0x1c1   : > { %v694_v12 = vpop.trf.xlu0 }
 0x1c2   : > { %710 = vmatmul.bf16.vlgmr.msra.gmra.mxu2 %v694_v12 }
 0x1d1   : > { %v695_v13 = vpop.trf.xlu0 }
 0x1d2   : > { %715 = vmatmul.bf16.gmra.mxu2 %v695_v13 }
 0x1e1   : > { %v696_v14 = vpop.trf.xlu0 }
 0x1e2   : > { %720 = vmatmul.bf16.gmra.mxu2 %v696_v14 }
 0x1f1   : > { %v697_v15 = vpop.trf.xlu0 }
 0x1f2   : > { %725 = vmatmul.bf16.gmra.mxu2 %v697_v15 }
 0x201   : > { %v698_v16 = vpop.trf.xlu0 }
 0x202   : > { %730 = vmatmul.bf16.gmra.mxu2 %v698_v16 }
 0x211   : > { %v699_v17 = vpop.trf.xlu0 }
 0x212   : > { %735 = vmatmul.bf16.gmra.mxu2 %v699_v17 }
 0x221   : > { %v700_v18 = vpop.trf.xlu0 }
 0x222   : > { %740 = vmatmul.bf16.vlgmr.msra.gmra.mxu3 %v700_v18 }
 0x231   : > { %v701_v19 = vpop.trf.xlu0 }
 0x232   : > { %745 = vmatmul.bf16.gmra.mxu3 %v701_v19 }
 0x245   : > { %v711_v21 = vpop.f32.mrf.mxu2 }
 0x246   : > { %v751_v22 = vadd.f32 %v711_v21, %v670_v20 }
 0x248   : > { %767 = vst [vmem:[#allocation2 + $0x30] sm:$0xff] %v751_v22 }
 0x24d   : > { %v713_v24 = vpop.f32.mrf.mxu2 }
 0x24e   : > { %v752_v25 = vadd.f32 %v713_v24, %v671_v23 }
 0x250   : > { %768 = vst [vmem:[#allocation2] sm:$0xff] %v752_v25 }
 0x255   : > { %v716_v27 = vpop.f32.mrf.mxu2 }
 0x256   : > { %v753_v28 = vadd.f32 %v716_v27, %v672_v26 }
 0x258   : > { %769 = vst [vmem:[#allocation2 + $0x58] sm:$0xff] %v753_v28 }
 0x25d   : > { %v718_v30 = vpop.f32.mrf.mxu2 }
 0x25e   : > { %v754_v31 = vadd.f32 %v718_v30, %v673_v29 }
 0x260   : > { %770 = vst [vmem:[#allocation2 + $0x18] sm:$0xff] %v754_v31 }
 0x265   : > { %v721_v33 = vpop.f32.mrf.mxu2 }
 0x266   : > { %v755_v34 = vadd.f32 %v721_v33, %v674_v32 }
 0x268   : > { %771 = vst [vmem:[#allocation2 + $0x50] sm:$0xff] %v755_v34 }
 0x26d   : > { %v723_v36 = vpop.f32.mrf.mxu2 }
 0x26e   : > { %v756_v37 = vadd.f32 %v723_v36, %v675_v35 }
 0x270   : > { %772 = vst [vmem:[#allocation2 + $0x68] sm:$0xff] %v756_v37 }
 0x275   : > { %v726_v39 = vpop.f32.mrf.mxu2 }
 0x276   : > { %v757_v40 = vadd.f32 %v726_v39, %v676_v38 }
 0x278   : > { %773 = vst [vmem:[#allocation2 + $0x8] sm:$0xff] %v757_v40 }
 0x27d   : > { %v728_v42 = vpop.f32.mrf.mxu2 }
 0x27e   : > { %v758_v43 = vadd.f32 %v728_v42, %v677_v41 }
 0x280   : > { %774 = vst [vmem:[#allocation2 + $0x48] sm:$0xff] %v758_v43 }
 0x285   : > { %v731_v45 = vpop.f32.mrf.mxu2 }
 0x286   : > { %v759_v46 = vadd.f32 %v731_v45, %v678_v44 }
 0x288   : > { %775 = vst [vmem:[#allocation2 + $0x40] sm:$0xff] %v759_v46 }
 0x28d   : > { %v733_v48 = vpop.f32.mrf.mxu2 }
 0x28e   : > { %v760_v49 = vadd.f32 %v733_v48, %v679_v47 }
 0x290   : > { %776 = vst [vmem:[#allocation2 + $0x20] sm:$0xff] %v760_v49 }
 0x295   : > { %v736_v51 = vpop.f32.mrf.mxu2 }
 0x296   : > { %v761_v52 = vadd.f32 %v736_v51, %v680_v50 }
 0x298   : > { %777 = vst [vmem:[#allocation2 + $0x10] sm:$0xff] %v761_v52 }
 0x29d   : > { %v738_v54 = vpop.f32.mrf.mxu2 }
 0x29e   : > { %v762_v55 = vadd.f32 %v738_v54, %v681_v53 }
 0x2a0   : > { %778 = vst [vmem:[#allocation2 + $0x38] sm:$0xff] %v762_v55 }
 0x2a5   : > { %v741_v57 = vpop.f32.mrf.mxu3 }
 0x2a6   : > { %v763_v58 = vadd.f32 %v741_v57, %v682_v56 }
 0x2a8   : > { %779 = vst [vmem:[#allocation2 + $0x60] sm:$0xff] %v763_v58 }
 0x2ad   : > { %v743_v61 = vpop.f32.mrf.mxu3 }
 0x2ae   : > { %v764_v62 = vadd.f32 %v743_v61, %v683_v59 }
 0x2b0   : > { %780 = vst [vmem:[#allocation2 + $0x70] sm:$0xff] %v764_v62 }
 0x2b5   : > { %v746_v0 = vpop.f32.mrf.mxu3 }
 0x2b6   : > { %v765_v1 = vadd.f32 %v746_v0, %v684_v63 }
 0x2b8   : > { %781 = vst [vmem:[#allocation2 + $0x78] sm:$0xff] %v765_v1 }
 0x2bc   : > { %786 = sbr.rel (%p1266_p1) target bundleno = 1066 (0x42a), region = 76 }
 0x2bd   : > { %v748_v3 = vpop.f32.mrf.mxu3 }
 0x2be   : > { %v766_v4 = vadd.f32 %v748_v3, %v685_v2 }
 0x2c0   : > { %782 = vst [vmem:[#allocation2 + $0x28] sm:$0xff] %v766_v4 }
 0x2c1   : > { %v801_v7 = vld [vmem:[#allocation2 + $0x78] sm:$0xff]  ;;  %v800_v6 = vld [vmem:[#allocation2 + $0x70] sm:$0xff]  ;;  %v799_v8 = vld [vmem:[#allocation2 + $0x60] sm:$0xff] }
 0x2c2   : > { %v798_v9 = vld [vmem:[#allocation2 + $0x38] sm:$0xff]  ;;  %v797_v10 = vld [vmem:[#allocation2 + $0x10] sm:$0xff]  ;;  %v796_v11 = vld [vmem:[#allocation2 + $0x20] sm:$0xff] }
 0x2c3   : > { %v795_v60 = vld [vmem:[#allocation2 + $0x40] sm:$0xff]  ;;  %v794_v12 = vld [vmem:[#allocation2 + $0x48] sm:$0xff]  ;;  %v791_v15 = vld [vmem:[#allocation2 + $0x50] sm:$0xff] }
 0x2c4   : > { %v793_v13 = vld [vmem:[#allocation2 + $0x8] sm:$0xff]  ;;  %v790_v16 = vld [vmem:[#allocation2 + $0x18] sm:$0xff]  ;;  %v788_v18 = vld [vmem:[#allocation2] sm:$0xff] }
 0x2c5   : > { %v792_v14 = vld [vmem:[#allocation2 + $0x68] sm:$0xff]  ;;  %v789_v17 = vld [vmem:[#allocation2 + $0x58] sm:$0xff]  ;;  %v787_v19 = vld [vmem:[#allocation2 + $0x30] sm:$0xff] }
 0x2c6   : > { %v811_v20 = vld [vmem:[#allocation9 + $0x40] sm:$0xff]  ;;  %v812_v22 = vld [vmem:[#allocation9 + $0x48] sm:$0xff]  ;;  %v813_v24 = vld [vmem:[#allocation9 + $0x50] sm:$0xff] }
 0x2c7   : > { %v802_v5 = vld [vmem:[#allocation2 + $0x28] sm:$0xff]  ;;  %v805_v25 = vld [vmem:[#allocation9 + $0x10] sm:$0xff]  ;;  %v814_v26 = vld [vmem:[#allocation9 + $0x58] sm:$0xff] }
 0x2c8   : > { %1321 = vmatpush.msra.mxu2 %v802_v5  ;;  %819 = vmatpush.msra.mxu0 %v802_v5  ;;  %v803_v21 = vld [vmem:[#allocation9] sm:$0xff]  ;;  %v804_v23 = vld [vmem:[#allocation9 + $0x8] sm:$0xff]  ;;  %v806_v27 = vld [vmem:[#allocation9 + $0x18] sm:$0xff] }
 0x2c9   : > { %v899_v28 = vld [vmem:[#allocation11 + $0x78] sm:$0xff]  ;;  %v898_v29 = vld [vmem:[#allocation11 + $0x70] sm:$0xff]  ;;  %v897_v30 = vld [vmem:[#allocation11 + $0x68] sm:$0xff] }
 0x2ca   : > { %1322 = vmatpush.msra.mxu2 %v801_v7  ;;  %820 = vmatpush.msra.mxu0 %v801_v7  ;;  %v896_v31 = vld [vmem:[#allocation11 + $0x60] sm:$0xff]  ;;  %v895_v34 = vld [vmem:[#allocation11 + $0x58] sm:$0xff]  ;;  %v894_v35 = vld [vmem:[#allocation11 + $0x50] sm:$0xff] }
 0x2cb   : > { %1337 = vmatpush.msra.mxu3 %v899_v28  ;;  %916 = vmatpush.msra.mxu1 %v899_v28  ;;  %v815_v32 = vld [vmem:[#allocation9 + $0x60] sm:$0xff]  ;;  %v893_v36 = vld [vmem:[#allocation11 + $0x48] sm:$0xff]  ;;  %v891_v40 = vld [vmem:[#allocation11 + $0x38] sm:$0xff] }
 0x2cc   : > { %1323 = vmatpush.msra.mxu2 %v800_v6  ;;  %821 = vmatpush.msra.mxu0 %v800_v6  ;;  %v807_v33 = vld [vmem:[#allocation9 + $0x20] sm:$0xff]  ;;  %v816_v38 = vld [vmem:[#allocation9 + $0x68] sm:$0xff]  ;;  %v890_v41 = vld [vmem:[#allocation11 + $0x30] sm:$0xff] }
 0x2cd   : > { %1338 = vmatpush.msra.mxu3 %v898_v29  ;;  %917 = vmatpush.msra.mxu1 %v898_v29  ;;  %v892_v37 = vld [vmem:[#allocation11 + $0x40] sm:$0xff]  ;;  %v808_v39 = vld [vmem:[#allocation9 + $0x28] sm:$0xff]  ;;  %v817_v44 = vld [vmem:[#allocation9 + $0x70] sm:$0xff] }
 0x2ce   : > { %1324 = vmatpush.msra.mxu2 %v799_v8  ;;  %822 = vmatpush.msra.mxu0 %v799_v8  ;;  %v889_v42 = vld [vmem:[#allocation11 + $0x28] sm:$0xff]  ;;  %v888_v43 = vld [vmem:[#allocation11 + $0x20] sm:$0xff]  ;;  %v809_v45 = vld [vmem:[#allocation9 + $0x30] sm:$0xff] }
 0x2cf   : > { %1339 = vmatpush.msra.mxu3 %v897_v30  ;;  %918 = vmatpush.msra.mxu1 %v897_v30  ;;  %v887_v46 = vld [vmem:[#allocation11 + $0x18] sm:$0xff]  ;;  %v886_v47 = vld [vmem:[#allocation11 + $0x10] sm:$0xff]  ;;  %v885_v48 = vld [vmem:[#allocation11 + $0x8] sm:$0xff] }
 0x2d0   : > { %1325 = vmatpush.msra.mxu2 %v798_v9  ;;  %823 = vmatpush.msra.mxu0 %v798_v9  ;;  %v818_v49 = vld [vmem:[#allocation9 + $0x78] sm:$0xff]  ;;  %v884_v51 = vld [vmem:[#allocation11] sm:$0xff]  ;;  %v901_v8 = vld [vmem:[#allocation12 + $0x8] sm:$0xff] }
 0x2d1   : > { %1340 = vmatpush.msra.mxu3 %v896_v31  ;;  %919 = vmatpush.msra.mxu1 %v896_v31  ;;  %v810_v50 = vld [vmem:[#allocation9 + $0x38] sm:$0xff]  ;;  %v900_v5 = vld [vmem:[#allocation12] sm:$0xff]  ;;  %v905_v31 = vld [vmem:[#allocation12 + $0x28] sm:$0xff] }
 0x2d2   : > { %1326 = vmatpush.msra.mxu2 %v797_v10  ;;  %824 = vmatpush.msra.mxu0 %v797_v10  ;;  %v911_v28 = vld [vmem:[#allocation12 + $0x58] sm:$0xff] }
 0x2d3   : > { %1341 = vmatpush.msra.mxu3 %v895_v34  ;;  %920 = vmatpush.msra.mxu1 %v895_v34  ;;  %v912_v34 = vld [vmem:[#allocation12 + $0x60] sm:$0xff] }
 0x2d4   : > { %1327 = vmatpush.msra.mxu2 %v796_v11  ;;  %825 = vmatpush.msra.mxu0 %v796_v11  ;;  %v908_v11 = vld [vmem:[#allocation12 + $0x40] sm:$0xff] }
 0x2d5   : > { %1342 = vmatpush.msra.mxu3 %v894_v35  ;;  %921 = vmatpush.msra.mxu1 %v894_v35 }
 0x2d6   : > { %1328 = vmatpush.msra.mxu2 %v795_v60  ;;  %826 = vmatpush.msra.mxu0 %v795_v60 }
 0x2d7   : > { %1343 = vmatpush.msra.mxu3 %v893_v36  ;;  %922 = vmatpush.msra.mxu1 %v893_v36 }
 0x2d8   : > { %1329 = vmatpush.msra.mxu2 %v794_v12  ;;  %827 = vmatpush.msra.mxu0 %v794_v12 }
 0x2d9   : > { %1344 = vmatpush.msra.mxu3 %v892_v37  ;;  %923 = vmatpush.msra.mxu1 %v892_v37  ;;  %v906_v37 = vld [vmem:[#allocation12 + $0x30] sm:$0xff] }
 0x2da   : > { %1330 = vmatpush.msra.mxu2 %v793_v13  ;;  %828 = vmatpush.msra.mxu0 %v793_v13  ;;  %v902_v13 = vld [vmem:[#allocation12 + $0x10] sm:$0xff] }
 0x2db   : > { %1345 = vmatpush.msra.mxu3 %v891_v40  ;;  %924 = vmatpush.msra.mxu1 %v891_v40  ;;  %v913_v40 = vld [vmem:[#allocation12 + $0x68] sm:$0xff] }
 0x2dc   : > { %1331 = vmatpush.msra.mxu2 %v792_v14  ;;  %829 = vmatpush.msra.mxu0 %v792_v14 }
 0x2dd   : > { %1346 = vmatpush.msra.mxu3 %v890_v41  ;;  %925 = vmatpush.msra.mxu1 %v890_v41 }
 0x2de   : > { %1332 = vmatpush.msra.mxu2 %v791_v15  ;;  %830 = vmatpush.msra.mxu0 %v791_v15 }
 0x2df   : > { %1347 = vmatpush.msra.mxu3 %v889_v42  ;;  %926 = vmatpush.msra.mxu1 %v889_v42 }
 0x2e0   : > { %1333 = vmatpush.msra.mxu2 %v790_v16  ;;  %831 = vmatpush.msra.mxu0 %v790_v16  ;;  %v909_v16 = vld [vmem:[#allocation12 + $0x48] sm:$0xff] }
 0x2e1   : > { %1348 = vmatpush.msra.mxu3 %v888_v43  ;;  %927 = vmatpush.msra.mxu1 %v888_v43  ;;  %v907_v43 = vld [vmem:[#allocation12 + $0x38] sm:$0xff] }
 0x2e2   : > { %1334 = vmatpush.msra.mxu2 %v789_v17  ;;  %832 = vmatpush.msra.mxu0 %v789_v17 }
 0x2e3   : > { %1349 = vmatpush.msra.mxu3 %v887_v46  ;;  %928 = vmatpush.msra.mxu1 %v887_v46  ;;  %v914_v46 = vld [vmem:[#allocation12 + $0x70] sm:$0xff] }
 0x2e4   : > { %1335 = vmatpush.msra.mxu2 %v788_v18  ;;  %833 = vmatpush.msra.mxu0 %v788_v18 }
 0x2e5   : > { %1350 = vmatpush.msra.mxu3 %v886_v47  ;;  %929 = vmatpush.msra.mxu1 %v886_v47 }
 0x2e6   : > { %1336 = vmatpush.msra.mxu2 %v787_v19  ;;  %834 = vmatpush.msra.mxu0 %v787_v19  ;;  %v903_v19 = vld [vmem:[#allocation12 + $0x18] sm:$0xff] }
 0x2e7   : > { %859 = vmatmul.f32.vlgmr.msra.gmra.mxu2 %v811_v20  ;;  %835 = vmatmul.f32.vlgmr.msra.gmra.mxu0 %v803_v21 }
 0x2e8   : > { %1351 = vmatpush.msra.mxu3 %v885_v48  ;;  %930 = vmatpush.msra.mxu1 %v885_v48 }
 0x2ea   : > { %1352 = vmatpush.msra.mxu3 %v884_v51  ;;  %931 = vmatpush.msra.mxu1 %v884_v51 }
 0x2ef   : > { %862 = vmatmul.f32.gmra.mxu2 %v812_v22  ;;  %838 = vmatmul.f32.gmra.mxu0 %v804_v23  ;;  %v910_v22 = vld [vmem:[#allocation12 + $0x50] sm:$0xff] }
 0x2f7   : > { %865 = vmatmul.f32.gmra.mxu2 %v813_v24  ;;  %841 = vmatmul.f32.gmra.mxu0 %v805_v25  ;;  %v904_v25 = vld [vmem:[#allocation12 + $0x20] sm:$0xff] }
 0x2ff   : > { %868 = vmatmul.f32.gmra.mxu2 %v814_v26  ;;  %844 = vmatmul.f32.gmra.mxu0 %v806_v27 }
 0x307   : > { %871 = vmatmul.f32.gmra.mxu2 %v815_v32  ;;  %847 = vmatmul.f32.gmra.mxu0 %v807_v33 }
 0x30f   : > { %874 = vmatmul.f32.gmra.mxu2 %v816_v38  ;;  %850 = vmatmul.f32.gmra.mxu0 %v808_v39 }
 0x317   : > { %877 = vmatmul.f32.gmra.mxu2 %v817_v44  ;;  %853 = vmatmul.f32.gmra.mxu0 %v809_v45 }
 0x31f   : > { %880 = vmatmul.f32.gmra.mxu2 %v818_v49  ;;  %856 = vmatmul.f32.gmra.mxu0 %v810_v50  ;;  %v915_v49 = vld [vmem:[#allocation12 + $0x78] sm:$0xff] }
 0x364   : > { %v836_v52 = vpop.f32.mrf.mxu0 }
 0x365   : > { %932 = vmatmul.f32.vlgmr.msra.gmra.mxu1 %v836_v52 }
 0x36a   : > { %v860_v53 = vpop.f32.mrf.mxu2 }
 0x36b   : > { %956 = vmatmul.f32.vlgmr.msra.gmra.mxu3 %v860_v53 }
 0x36c   : > { %v839_v54 = vpop.f32.mrf.mxu0 }
 0x36d   : > { %935 = vmatmul.f32.gmra.mxu1 %v839_v54 }
 0x372   : > { %v863_v55 = vpop.f32.mrf.mxu2 }
 0x373   : > { %959 = vmatmul.f32.gmra.mxu3 %v863_v55 }
 0x374   : > { %v842_v56 = vpop.f32.mrf.mxu0 }
 0x375   : > { %938 = vmatmul.f32.gmra.mxu1 %v842_v56 }
 0x37a   : > { %v866_v57 = vpop.f32.mrf.mxu2 }
 0x37b   : > { %962 = vmatmul.f32.gmra.mxu3 %v866_v57 }
 0x37c   : > { %v845_v58 = vpop.f32.mrf.mxu0 }
 0x37d   : > { %941 = vmatmul.f32.gmra.mxu1 %v845_v58 }
 0x382   : > { %v869_v59 = vpop.f32.mrf.mxu2 }
 0x383   : > { %965 = vmatmul.f32.gmra.mxu3 %v869_v59 }
 0x384   : > { %v848_v61 = vpop.f32.mrf.mxu0 }
 0x385   : > { %944 = vmatmul.f32.gmra.mxu1 %v848_v61 }
 0x38a   : > { %v872_v62 = vpop.f32.mrf.mxu2 }
 0x38b   : > { %968 = vmatmul.f32.gmra.mxu3 %v872_v62 }
 0x38c   : > { %v851_v63 = vpop.f32.mrf.mxu0 }
 0x38d   : > { %947 = vmatmul.f32.gmra.mxu1 %v851_v63 }
 0x392   : > { %v875_v0 = vpop.f32.mrf.mxu2 }
 0x393   : > { %971 = vmatmul.f32.gmra.mxu3 %v875_v0 }
 0x394   : > { %v854_v1 = vpop.f32.mrf.mxu0 }
 0x395   : > { %950 = vmatmul.f32.gmra.mxu1 %v854_v1 }
 0x39a   : > { %v878_v2 = vpop.f32.mrf.mxu2 }
 0x39b   : > { %974 = vmatmul.f32.gmra.mxu3 %v878_v2 }
 0x39c   : > { %v857_v3 = vpop.f32.mrf.mxu0 }
 0x39d   : > { %953 = vmatmul.f32.gmra.mxu1 %v857_v3 }
 0x3a2   : > { %v881_v4 = vpop.f32.mrf.mxu2 }
 0x3a3   : > { %977 = vmatmul.f32.gmra.mxu3 %v881_v4 }
 0x3e2   : > { %v933_v7 = vpop.f32.mrf.mxu1 }
 0x3e3   : > { %v934_v6 = vadd.f32 %v933_v7, %v900_v5 }
 0x3e5   : > { %981 = vst [vmem:[%s2063_s14] sm:$0xff] %v934_v6 }
 0x3ea   : > { %v936_v9 = vpop.f32.mrf.mxu1 }
 0x3eb   : > { %v937_v10 = vadd.f32 %v936_v9, %v901_v8 }
 0x3ed   : > { %982 = vst [vmem:[%s2063_s14 + $0x8] sm:$0xff] %v937_v10 }
 0x3ee   : > { %v957_v60 = vpop.f32.mrf.mxu3 }
 0x3ef   : > { %v958_v12 = vadd.f32 %v957_v60, %v908_v11 }
 0x3f1   : > { %989 = vst [vmem:[%s2063_s14 + $0x40] sm:$0xff] %v958_v12 }
 0x3f2   : > { %v939_v14 = vpop.f32.mrf.mxu1 }
 0x3f3   : > { %v940_v15 = vadd.f32 %v939_v14, %v902_v13 }
 0x3f5   : > { %983 = vst [vmem:[%s2063_s14 + $0x10] sm:$0xff] %v940_v15 }
 0x3f6   : > { %v960_v17 = vpop.f32.mrf.mxu3 }
 0x3f7   : > { %v961_v18 = vadd.f32 %v960_v17, %v909_v16 }
 0x3f9   : > { %990 = vst [vmem:[%s2063_s14 + $0x48] sm:$0xff] %v961_v18 }
 0x3fa   : > { %v942_v20 = vpop.f32.mrf.mxu1 }
 0x3fb   : > { %v943_v21 = vadd.f32 %v942_v20, %v903_v19 }
 0x3fd   : > { %984 = vst [vmem:[%s2063_s14 + $0x18] sm:$0xff] %v943_v21 }
 0x3fe   : > { %v963_v23 = vpop.f32.mrf.mxu3 }
 0x3ff   : > { %v964_v24 = vadd.f32 %v963_v23, %v910_v22 }
 0x401   : > { %991 = vst [vmem:[%s2063_s14 + $0x50] sm:$0xff] %v964_v24 }
 0x402   : > { %v945_v26 = vpop.f32.mrf.mxu1 }
 0x403   : > { %v946_v27 = vadd.f32 %v945_v26, %v904_v25 }
 0x405   : > { %985 = vst [vmem:[%s2063_s14 + $0x20] sm:$0xff] %v946_v27 }
 0x406   : > { %v966_v29 = vpop.f32.mrf.mxu3 }
 0x407   : > { %v967_v30 = vadd.f32 %v966_v29, %v911_v28 }
 0x409   : > { %992 = vst [vmem:[%s2063_s14 + $0x58] sm:$0xff] %v967_v30 }
 0x40a   : > { %v948_v32 = vpop.f32.mrf.mxu1 }
 0x40b   : > { %v949_v33 = vadd.f32 %v948_v32, %v905_v31 }
 0x40d   : > { %986 = vst [vmem:[%s2063_s14 + $0x28] sm:$0xff] %v949_v33 }
 0x40e   : > { %v969_v35 = vpop.f32.mrf.mxu3 }
 0x40f   : > { %v970_v36 = vadd.f32 %v969_v35, %v912_v34 }
 0x411   : > { %993 = vst [vmem:[%s2063_s14 + $0x60] sm:$0xff] %v970_v36 }
 0x412   : > { %v951_v38 = vpop.f32.mrf.mxu1 }
 0x413   : > { %v952_v39 = vadd.f32 %v951_v38, %v906_v37 }
 0x415   : > { %987 = vst [vmem:[%s2063_s14 + $0x30] sm:$0xff] %v952_v39 }
 0x416   : > { %v972_v41 = vpop.f32.mrf.mxu3 }
 0x417   : > { %v973_v42 = vadd.f32 %v972_v41, %v913_v40 }
 0x419   : > { %994 = vst [vmem:[%s2063_s14 + $0x68] sm:$0xff] %v973_v42 }
 0x41a   : > { %v954_v44 = vpop.f32.mrf.mxu1 }
 0x41b   : > { %v955_v45 = vadd.f32 %v954_v44, %v907_v43 }
 0x41d   : > { %988 = vst [vmem:[%s2063_s14 + $0x38] sm:$0xff] %v955_v45 }
 0x41e   : > { %v975_v47 = vpop.f32.mrf.mxu3 }
 0x41f   : > { %v976_v48 = vadd.f32 %v975_v47, %v914_v46 }
 0x421   : > { %995 = vst [vmem:[%s2063_s14 + $0x70] sm:$0xff] %v976_v48 }
 0x426   : > { %v978_v50 = vpop.f32.mrf.mxu3 }
 0x427   : > { %v979_v51 = vadd.f32 %v978_v50, %v915_v49 }
 0x429   : > { %996 = vst [vmem:[%s2063_s14 + $0x78] sm:$0xff] %v979_v51 }
 0x42a PF: > { %s2214_s18 = sld [smem:[#allocation21_spill]]  ;;  %s1010_s24 = sshll.u32 %s2063_s14, 4  ;;  %s1011_s24 = int_to_ptr.vmem [resolvable:$true] %s1010_s24 }
 0x42b   : > { %s2215_s10 = sld [smem:[#allocation30_spill]]  ;;  %s998_s19 = scalar_lea.sflag [#allocation5], %s366_s4 }
 0x430   : > { %s1296_s12 = sshll.u32 %s2214_s18, 7 }
 0x431   : > { %s1009_s1 = scalar_lea.hbm %s2215_s10, %s1296_s12  ;;  %s1713_s5 = scalar_lea.hbm %s2215_s10, 256 }
 0x432   : > { %s1012_s15 = sshll.u32 %s1009_s1, 4  ;;  %s1013_s15 = int_to_ptr.hbm [resolvable:$true] %s1012_s15 }
 0x433   : > { %s1707_s28 = sshra.s32 %s1013_s15, 4  ;;  %s1708_s28 = int_to_ptr.hbm [resolvable:$true] %s1707_s28 }
 0x434   : > { %s1709_s2 = scalar_lea.hbm %s1708_s28, 128  ;;  %p1714_p0 = scmp.lt.s32.totalorder %s1708_s28, %s2215_s10 }
 0x435   : > { %p1710_p11 = scmp.ne.s32.totalorder %s1708_s28, %s1709_s2  ;;  %p1715_p3 = scmp.lt.s32.totalorder %s1713_s5, %s1709_s2 }
 0x437   : > { %p1711_p12 = pnand %p1710_p11, %p2014_p7  ;;  %p1716_p5 = por %p1715_p3, %p1714_p0 }
 0x439   : > { %p1712_p13 = pneg %p1711_p12 }
 0x43b   : > { %p1717_p6 = pnand %p1716_p5, %p1712_p13 }
 0x43d   : > { %1720 = shalt.err (!%p1717_p6)
}
 0x43e   : > { %s1839_s4 = smov 128   ;;  %s1840_s14 = smov 8  }
 0x43f   : > { %1375 = dma.vmem_to_hbm [thread:$0]  (%p2014_p7), %s1011_s24, 2048, %s1013_s15, %s998_s19, %s1839_s4, %s1839_s4, %s1840_s14  }
 0x440 PF: > { %p1412_p8 = scmp.ge.s32.totalorder %s1827_s7, 2  ;;  %s1027_s9 = sand.u32 1, %s1787_s21  }
 0x441   : > { %s1028_s18 = scalar_lea.sflag [#allocation5], %s1027_s9 }
 0x442   : > { %p1398_p9 = pnand %p1412_p8, %p2027_p10 }
 0x444   : > { %p1399_p2 = pneg %p1398_p9 }
 0x446   : > { %1782 = dma.done.wait (%p1399_p2), %s1028_s18, 2048  }
 0x447   : > { %1784 = vsyncadd (%p1399_p2), %s1028_s18, 4294965248  ;;  %s25_s7 = sadd.s32 1, %s1827_s7   ;;  %s2216_s27 = sld [smem:[#allocation22_spill]] }
 0x448   : > { %p22_p4 = scmp.ge.s32.totalorder %s25_s7, 6   ;;  %s2217_s29 = sld [smem:[#allocation23_spill]] }
 0x449   : > { %s2218_s6 = sld [smem:[#allocation24_spill]]  ;;  %s2219_s21 = smov %s1791_s22 }
 0x44a   : > { %s2220_s22 = smov %s1795_s23  ;;  %s2221_s23 = smov %s2019_s13 }
 0x44b   : > { %s2222_s24 = smov %s1803_s25  ;;  %s2223_s25 = smov %s1807_s26 }
 0x44c   : > { %s2224_s26 = smov %s2022_s16  ;;  %s2225_s28 = smov %s1823_s30 }
 0x44d   :  { %24 = sbr.rel (!%p22_p4) target bundleno = 19 (0x13), region = 117 }
 0x44f   : > { %s2226_s30 = smov %s2218_s6 }
 0x452   :  { %1034 = vsyncpa [#allocation4], 1 }
 0x453   :  { %1036 = vsyncpa [#allocation4 + $0x1], 1 }
 0x454   :  { %1037 = vsyncpa [#allocation7], 1 }
 0x455   :  { %1038 = vsyncpa [#allocation10], 1 }
 0x456   :  { %1039 = vsyncpa [#allocation13], 1 }
 0x457   :  { %1040 = vsyncpa [#allocation5], 1 }
 0x458   :  { %1042 = vsyncpa [#allocation5 + $0x1], 1 }

</bundles_post_ra>
